<compile_context>
chip_gen: v7x
topology: tpu7x:2x2x1
jax: 0.10.0
libtpu: 0.0.40
codegen_flags: <defaults>
</compile_context>

<pallas_src>
import functools
from typing import NamedTuple

import jax
import jax.numpy as jnp
from jax.experimental import pallas as pl
from jax.experimental.pallas import tpu as pltpu


# --------------------------------------------------------------------------
# helpers
# --------------------------------------------------------------------------
def _round_up(x, m):
    return ((x + m - 1) // m) * m


def _vmem_budget_bytes():
    """~75% of this chip's physical VMEM (96 MiB v5e/v6e, 48 MiB v7x)."""
    try:
        info = pltpu.get_tpu_info()
        cap = getattr(info, "vmem_capacity_bytes", None)
        if cap:
            return int(cap * 0.75)
    except Exception:
        pass
    return 48 * 1024 * 1024  # conservative: safe on every generation


def _tile_candidates(total, cap=None):
    """Multiples of 128 dividing `total` (descending, largest ~12 + 128)."""
    cands = [d for d in range(total, 0, -128) if total % d == 0][:12]
    if 128 not in cands:
        cands.append(128)
    if cap is not None:
        capped = [d for d in cands if d <= cap]
        cands = capped or [min(cands)]
    return cands


def _batch_tile_candidates(B, cap=None):
    top = min(_round_up(B, 128), cap if cap else 1024)
    top = max(top, 128)
    return list(range(128, top + 1, 128))


def _select_config(B, in_p, hid_p, out_p, out_isz, usable_bytes,
                   max_tb=None, max_th=None, max_tn=None):
    """Pick (tb, th, tn) minimizing modelled HBM traffic within VMEM budget."""
    w_isz = 2  # bf16 activations/weights inside the kernel

    def evaluate(tb, th, tn):
        nh, nj = hid_p // th, out_p // tn
        B_pad = _round_up(B, tb)
        nb = B_pad // tb
        w1_bufs = 1 if nh == 1 else 2
        w2_bufs = 1 if (nh == 1 and nj == 1) else 2
        x_bufs = 1 if nb == 1 else 2
        acc = 0 if nh == 1 else tb * tn * 4
        footprint = (x_bufs * tb * in_p * w_isz
                     + w1_bufs * in_p * th * w_isz
                     + w2_bufs * th * tn * w_isz
                     + 2 * (th + tn) * 4          # b1/b2 blocks (f32)
                     + 2 * tb * tn * out_isz      # output block
                     + acc)
        # HBM traffic model (blocks with an unchanged index are not re-DMA'd).
        w1_reads = 1 if nh == 1 else nb * nj
        w2_reads = 1 if (nb == 1 or (nh == 1 and nj == 1)) else nb
        traffic = (B_pad * in_p * w_isz
                   + w1_reads * in_p * hid_p * w_isz
                   + w2_reads * hid_p * out_p * w_isz
                   + B_pad * out_p * out_isz)
        steps = nb * nj * nh
        # prefer: least traffic, then >=2 parallel steps (megacore / 2 TCs),
        # then fewest grid steps, then biggest tiles.
        key = (traffic, 0 if nb * nj >= 2 else 1, steps, -(tb * th * tn))
        cfg = dict(tb=tb, th=th, tn=tn, nb=nb, nj=nj, nh=nh, B_pad=B_pad,
                   traffic=traffic, footprint=footprint)
        return key, cfg

    th_cands = _tile_candidates(hid_p, max_th)
    tn_cands = _tile_candidates(out_p, max_tn)
    tb_cands = _batch_tile_candidates(B, max_tb)

    best = None
    for th in th_cands:
        for tn in tn_cands:
            for tb in tb_cands:
                key, cfg = evaluate(tb, th, tn)
                if cfg["footprint"] > usable_bytes:
                    continue
                if best is None or key < best[0]:
                    best = (key, cfg)
    if best is None:
        # Nothing fits the budget: fall back to the smallest lane-dense tiles.
        best = evaluate(128, min(th_cands), min(tn_cands))
    return best[1]


# --------------------------------------------------------------------------
# kernels
# --------------------------------------------------------------------------
def _mlp_partial(x_bf16, w1_ref, b1_ref, w2_ref, sub_chunk):
    """f32 partial sum of relu(x @ W1_slice + b1_slice) @ W2_slice.

    Optionally sub-tiles the hidden slice so the VPU bias/ReLU/cast epilogue
    of chunk j overlaps the fc1 MXU matmul of chunk j+1.
    """
    th = w1_ref.shape[1]
    if (sub_chunk and sub_chunk % 128 == 0 and th > sub_chunk
            and th % sub_chunk == 0):
        nsub, cs = th // sub_chunk, sub_chunk
    else:
        nsub, cs = 1, th
    acc = None
    for j in range(nsub):
        sl = pl.ds(j * cs, cs)
        h = jnp.dot(x_bf16, w1_ref[:, sl], preferred_element_type=jnp.float32)
        h = jnp.maximum(h + b1_ref[:, sl], 0.0)          # bias + ReLU in f32
        p = jnp.dot(h.astype(w2_ref.dtype), w2_ref[sl, :],
                    preferred_element_type=jnp.float32)
        acc = p if acc is None else acc + p
    return acc


def _expert_kernel_noacc(x_ref, w1_ref, b1_ref, w2_ref, b2_ref, o_ref,
                         *, sub_chunk):
    """nh == 1: the whole hidden dim is one tile -> write the result directly."""
    acc = _mlp_partial(x_ref[...], w1_ref, b1_ref, w2_ref, sub_chunk)
    o_ref[...] = (acc + b2_ref[...]).astype(o_ref.dtype)


def _expert_kernel_acc(x_ref, w1_ref, b1_ref, w2_ref, b2_ref, o_ref, acc_ref,
                       *, sub_chunk):
    """nh > 1: reduce over hidden tiles into an f32 VMEM accumulator."""
    kh = pl.program_id(2)

    @pl.when(kh == 0)
    def _init():
        acc_ref[...] = jnp.zeros_like(acc_ref)

    acc_ref[...] += _mlp_partial(x_ref[...], w1_ref, b1_ref, w2_ref, sub_chunk)

    @pl.when(kh == pl.num_programs(2) - 1)
    def _finalize():
        o_ref[...] = (acc_ref[...] + b2_ref[...]).astype(o_ref.dtype)


# --------------------------------------------------------------------------
# parameter preparation (once) + forward (per call)
# --------------------------------------------------------------------------
class ExpertParams(NamedTuple):
    w1: jax.Array          # (in_p, hid_p)  compute dtype
    b1: jax.Array          # (1, hid_p)     f32
    w2: jax.Array          # (hid_p, out_p) compute dtype
    b2: jax.Array          # (1, out_p)     f32
    input_dim: int
    hidden_dim: int
    output_dim: int


def prepare_expert_params(w1, b1, w2, b2, *, compute_dtype=jnp.bfloat16):
    """Pad feature dims to multiples of 128 and cast weights ONCE (setup time).

    w1: (input_dim, hidden_dim)   nn.Linear fc1 weight, transposed
    b1: (hidden_dim,)
    w2: (hidden_dim, output_dim)  nn.Linear fc2 weight, transposed
    b2: (output_dim,)
    """
    input_dim, hidden_dim = w1.shape
    output_dim = w2.shape[1]
    in_p = _round_up(input_dim, 128)
    hid_p = _round_up(hidden_dim, 128)
    out_p = _round_up(output_dim, 128)
    # Zero padding is exact through Linear+ReLU+Linear (sliced off at the end).
    w1p = jnp.pad(w1, ((0, in_p - input_dim), (0, hid_p - hidden_dim))).astype(compute_dtype)
    w2p = jnp.pad(w2, ((0, hid_p - hidden_dim), (0, out_p - output_dim))).astype(compute_dtype)
    b1p = jnp.pad(b1, (0, hid_p - hidden_dim)).astype(jnp.float32).reshape(1, hid_p)
    b2p = jnp.pad(b2, (0, out_p - output_dim)).astype(jnp.float32).reshape(1, out_p)
    return ExpertParams(w1p, b1p, w2p, b2p, input_dim, hidden_dim, output_dim)


def expert_forward(x, params: ExpertParams, *, sub_chunk=512,
                   max_tb=None, max_th=None, max_tn=None):
    """Fused Expert MLP forward: y = relu(x @ W1 + b1) @ W2 + b2.

    x: (B, input_dim); returns (B, output_dim) in x.dtype.
    """
    B, input_dim = x.shape
    assert input_dim == params.input_dim, "input_dim mismatch with prepared params"
    in_p, hid_p = params.w1.shape
    out_p = params.w2.shape[1]
    out_dtype = x.dtype
    compute_dtype = params.w1.dtype
    out_isz = jnp.dtype(out_dtype).itemsize

    budget = _vmem_budget_bytes()
    usable = int(budget * 0.8)          # headroom for compiler-internal scratch
    cfg = _select_config(B, in_p, hid_p, out_p, out_isz, usable,
                         max_tb=max_tb, max_th=max_th, max_tn=max_tn)
    tb, th, tn = cfg["tb"], cfg["th"], cfg["tn"]
    nb, nj, nh = cfg["nb"], cfg["nj"], cfg["nh"]
    B_pad = cfg["B_pad"]

    # Pad/cast the activation (per call; weights were prepared once).
    xp = x
    if (B_pad, in_p) != (B, input_dim):
        xp = jnp.pad(x, ((0, B_pad - B), (0, in_p - input_dim)))
    xp = xp.astype(compute_dtype)

    cost = pl.CostEstimate(
        flops=2 * B_pad * hid_p * (in_p + out_p),
        transcendentals=0,
        bytes_accessed=cfg["traffic"],
    )

    # Grid-invariant blocks only need a single VMEM buffer.
    def spec(shape, index_map, invariant):
        kw = {"pipeline_mode": pl.Buffered(1)} if invariant else {}
        return pl.BlockSpec(shape, index_map, **kw)

    in_specs = [
        spec((tb, in_p), lambda i, j, kh: (i, 0), nb == 1),              # x
        spec((in_p, th), lambda i, j, kh: (0, kh), nh == 1),             # W1
        pl.BlockSpec((1, th), lambda i, j, kh: (0, kh)),                 # b1
        spec((th, tn), lambda i, j, kh: (kh, j), nh == 1 and nj == 1),   # W2
        pl.BlockSpec((1, tn), lambda i, j, kh: (0, j)),                  # b2
    ]
    out_spec = pl.BlockSpec((tb, tn), lambda i, j, kh: (i, j))

    if nh == 1:
        kernel = functools.partial(_expert_kernel_noacc, sub_chunk=sub_chunk)
        scratch = []
    else:
        kernel = functools.partial(_expert_kernel_acc, sub_chunk=sub_chunk)
        scratch = [pltpu.VMEM((tb, tn), jnp.float32)]

    yp = pl.pallas_call(
        kernel,
        out_shape=jax.ShapeDtypeStruct((B_pad, out_p), out_dtype),
        grid_spec=pltpu.PrefetchScalarGridSpec(
            num_scalar_prefetch=0,
            grid=(nb, nj, nh),
            in_specs=in_specs,
            out_specs=out_spec,
            scratch_shapes=scratch,
        ),
        compiler_params=pltpu.CompilerParams(
            dimension_semantics=("parallel", "parallel", "arbitrary"),
            vmem_limit_bytes=budget,
        ),
        cost_estimate=cost,
    )(xp, params.w1, params.b1, params.w2, params.b2)

    return yp[:B, :params.output_dim]


# --------------------------------------------------------------------------
# pure-JAX references
# --------------------------------------------------------------------------
def reference_expert(x, w1, b1, w2, b2, compute_dtype=None):
    """Pure-JAX reference; optionally mirrors the kernel's bf16 matmul path."""
    if compute_dtype is not None:
        xd, w1d, w2d = (x.astype(compute_dtype), w1.astype(compute_dtype),
                        w2.astype(compute_dtype))
    else:
        xd, w1d, w2d = x, w1, w2
    h = jnp.dot(xd, w1d, preferred_element_type=jnp.float32) + b1
    h = jnp.maximum(h, 0.0)
    if compute_dtype is not None:
        h = h.astype(compute_dtype)
    y = jnp.dot(h, w2d, preferred_element_type=jnp.float32) + b2
    return y.astype(x.dtype)


# --------------------------------------------------------------------------
# self-test
# --------------------------------------------------------------------------
if __name__ == "__main__":
    def check(B, input_dim, hidden_dim, output_dim, **fwd_kwargs):
        key = jax.random.PRNGKey(0)
        kx, k1, k2, k3, k4 = jax.random.split(key, 5)
        x = jax.random.normal(kx, (B, input_dim), dtype=jnp.float32)
        w1 = jax.random.normal(k1, (input_dim, hidden_dim), dtype=jnp.float32) * 0.1
        b1 = jax.random.normal(k2, (hidden_dim,), dtype=jnp.float32) * 0.1
        w2 = jax.random.normal(k3, (hidden_dim, output_dim), dtype=jnp.float32) * 0.1
        b2 = jax.random.normal(k4, (output_dim,), dtype=jnp.float32) * 0.1

        params = prepare_expert_params(w1, b1, w2, b2)
        out = jax.block_until_ready(expert_forward(x, params, **fwd_kwargs))
        assert out.shape == (B, output_dim)

        # Tight check vs a reference using the same bf16-matmul/f32-acc path.
        ref_bf16 = reference_expert(x, w1, b1, w2, b2, compute_dtype=jnp.bfloat16)
        assert jnp.allclose(out, ref_bf16, atol=1e-2, rtol=1e-2), "mismatch vs bf16 reference"
        # Loose semantic sanity check vs the full-f32 reference.
        ref_f32 = reference_expert(x, w1, b1, w2, b2)
        assert jnp.allclose(out, ref_f32, atol=1e-1, rtol=1e-1), "mismatch vs f32 reference"

    # 1) single hidden tile (direct-write kernel), lane-padding of in/out dims,
    #    2 parallel batch steps (feeds both cores / megacore halves).
    check(256, 64, 128, 64)
    # 2) hidden dim split into 3 reduction tiles (f32 VMEM accumulator path).
    check(128, 96, 384, 192, max_th=128)
    # 3) resident weights with in-kernel hidden sub-chunking (MXU/VPU overlap).
    check(128, 96, 384, 192, sub_chunk=128)

    print("KERNEL_OK")
</pallas_src>

<mosaic_0001>
module attributes {stable_mosaic.version = 11 : i64} {
  func.func @_expert_kernel_noacc(%arg0: i32, %arg1: i32, %arg2: i32, %arg3: memref<128x128xbf16, #tpu.memory_space<vmem>>, %arg4: memref<128x128xbf16, #tpu.memory_space<vmem>>, %arg5: memref<1x128xf32, #tpu.memory_space<vmem>>, %arg6: memref<128x128xbf16, #tpu.memory_space<vmem>>, %arg7: memref<1x128xf32, #tpu.memory_space<vmem>>, %arg8: memref<128x128xf32, #tpu.memory_space<vmem>>) attributes {dimension_semantics = [#tpu.dimension_semantics<parallel>, #tpu.dimension_semantics<parallel>, #tpu.dimension_semantics<arbitrary>], iteration_bounds = array<i64: 2, 1, 1>, scalar_prefetch = 0 : i64, scratch_operands = 0 : i64, tpu.core_type = #tpu.core_type<tc>, window_params = [{transform_indices = @transform_0, window_bounds = array<i64: 128, 128>}, {pipeline_mode = #tpu.pipeline_mode<synchronous>, transform_indices = @transform_1, window_bounds = array<i64: 128, 128>}, {transform_indices = @transform_2, window_bounds = array<i64: 1, 128>}, {pipeline_mode = #tpu.pipeline_mode<synchronous>, transform_indices = @transform_3, window_bounds = array<i64: 128, 128>}, {transform_indices = @transform_4, window_bounds = array<i64: 1, 128>}, {transform_indices = @transform_5, window_bounds = array<i64: 128, 128>}]} {
    %c0 = arith.constant 0 : index
    %c0_0 = arith.constant 0 : index
    %0 = vector.load %arg3[%c0, %c0_0] : memref<128x128xbf16, #tpu.memory_space<vmem>>, vector<128x128xbf16>
    %c0_1 = arith.constant 0 : index
    %c0_2 = arith.constant 0 : index
    %1 = vector.load %arg4[%c0_1, %c0_2] : memref<128x128xbf16, #tpu.memory_space<vmem>>, vector<128x128xbf16>
    %cst = arith.constant dense<0.000000e+00> : vector<128x128xf32>
    %2 = tpu.matmul %0, %1, %cst {dimension_numbers = #tpu.dot_dimension_numbers<[1], [0], [0], [1], [0, 0, 1, 1], [], []>} : vector<128x128xbf16>, vector<128x128xbf16>, vector<128x128xf32> -> vector<128x128xf32>
    %c0_3 = arith.constant 0 : index
    %c0_4 = arith.constant 0 : index
    %3 = vector.load %arg5[%c0_3, %c0_4] : memref<1x128xf32, #tpu.memory_space<vmem>>, vector<1x128xf32>
    %4 = vector.broadcast %3 : vector<1x128xf32> to vector<128x128xf32>
    %5 = arith.addf %2, %4 : vector<128x128xf32>
    %cst_5 = arith.constant 0.000000e+00 : f32
    %6 = vector.broadcast %cst_5 : f32 to vector<128x128xf32>
    %7 = arith.maximumf %5, %6 : vector<128x128xf32>
    %8 = arith.truncf %7 : vector<128x128xf32> to vector<128x128xbf16>
    %c0_6 = arith.constant 0 : index
    %c0_7 = arith.constant 0 : index
    %9 = vector.load %arg6[%c0_6, %c0_7] : memref<128x128xbf16, #tpu.memory_space<vmem>>, vector<128x128xbf16>
    %cst_8 = arith.constant dense<0.000000e+00> : vector<128x128xf32>
    %10 = tpu.matmul %8, %9, %cst_8 {dimension_numbers = #tpu.dot_dimension_numbers<[1], [0], [0], [1], [0, 0, 1, 1], [], []>} : vector<128x128xbf16>, vector<128x128xbf16>, vector<128x128xf32> -> vector<128x128xf32>
    %c0_9 = arith.constant 0 : index
    %c0_10 = arith.constant 0 : index
    %11 = vector.load %arg7[%c0_9, %c0_10] : memref<1x128xf32, #tpu.memory_space<vmem>>, vector<1x128xf32>
    %12 = vector.broadcast %11 : vector<1x128xf32> to vector<128x128xf32>
    %13 = arith.addf %10, %12 : vector<128x128xf32>
    %c0_11 = arith.constant 0 : index
    %c0_12 = arith.constant 0 : index
    %14 = vector.load %arg8[%c0_11, %c0_12] : memref<128x128xf32, #tpu.memory_space<vmem>>, vector<128x128xf32>
    tpu.vector_store %arg8[%c0_11, %c0_12], %13 {strides = array<i32>} : memref<128x128xf32, #tpu.memory_space<vmem>>, vector<128x128xf32>,
    return
  }
  func.func @transform_0(%arg0: i32, %arg1: i32, %arg2: i32) -> (i32, i32) {
    %c0_i32 = arith.constant 0 : i32
    %c0_i32_0 = arith.constant 0 : i32
    return %arg0, %c0_i32 : i32, i32
  }
  func.func @transform_1(%arg0: i32, %arg1: i32, %arg2: i32) -> (i32, i32) {
    %c0_i32 = arith.constant 0 : i32
    %c0_i32_0 = arith.constant 0 : i32
    return %c0_i32, %arg2 : i32, i32
  }
  func.func @transform_2(%arg0: i32, %arg1: i32, %arg2: i32) -> (i32, i32) {
    %c0_i32 = arith.constant 0 : i32
    %c0_i32_0 = arith.constant 0 : i32
    return %c0_i32, %arg2 : i32, i32
  }
  func.func @transform_3(%arg0: i32, %arg1: i32, %arg2: i32) -> (i32, i32) {
    %c0_i32 = arith.constant 0 : i32
    return %arg2, %arg1 : i32, i32
  }
  func.func @transform_4(%arg0: i32, %arg1: i32, %arg2: i32) -> (i32, i32) {
    %c0_i32 = arith.constant 0 : i32
    %c0_i32_0 = arith.constant 0 : i32
    return %c0_i32, %arg1 : i32, i32
  }
  func.func @transform_5(%arg0: i32, %arg1: i32, %arg2: i32) -> (i32, i32) {
    %c0_i32 = arith.constant 0 : i32
    return %arg0, %arg1 : i32, i32
  }
}

</mosaic_0001>

<bundles_post_ra>
// kernel: tpu_custom_call.1
= control target key start
LH: loop header
LB: loop body
LE: loop exit
PB: predicated region body
PF: predicated region fallthrough
CT: control target
= control target key end

     0   :  { %10 = vsyncpa [#allocation3], 0  ;;  %s1701_s0 = inlined_call_operand.hbm [shape: bf16[256,128], index: 0, kind: input, shape index: {}]   ;;  %s1702_s1 = inlined_call_operand.hbm [shape: bf16[128,128], index: 1, kind: input, shape index: {}]   ;;  %s1703_s2 = inlined_call_operand.vmem [shape: f32[1,128], index: 2, kind: input, shape index: {}]   ;;  %s1704_s3 = inlined_call_operand.hbm [shape: bf16[128,128], index: 3, kind: input, shape index: {}]   ;;  %s1705_s4 = inlined_call_operand.vmem [shape: f32[1,128], index: 4, kind: input, shape index: {}]   ;;  %s1706_s5 = inlined_call_operand.hbm [shape: f32[256,128], index: 5, kind: output, shape index: {}]  }
   0x1   :  { %12 = vsyncpa [#allocation3 + $0x1], 0 }
   0x2   :  { %13 = vsyncpa [#allocation6], 0 }
   0x3   :  { %14 = vsyncpa [#allocation4], 0 }
   0x4   :  { %16 = vsyncpa [#allocation4 + $0x1], 0  ;;  %s1401_s18 = smov 0   ;;  %s1403_s19 = smov 0  }
   0x5   :  { %s1405_s20 = smov 0   ;;  %s1407_s21 = smov 0  }
   0x6   :  { %s1409_s22 = smov 0   ;;  %s1411_s23 = smov 0  }
   0x7 LB: > { %s933_s24 = sadd.s32 4294967295, %s1361_s23   ;;  %s934_s25 = sadd.s32 4294967294, %s1361_s23   ;;  %s1361_s23 = sphi %s1411_s23, %s22_s23   ;;  %s1357_s22 = sphi %s1409_s22, %s1730_s22   ;;  %s1353_s21 = sphi %s1407_s21, %s1729_s21   ;;  %s1349_s20 = sphi %s1405_s20, %s1728_s20   ;;  %s1345_s19 = sphi %s1403_s19, %s1727_s19   ;;  %s1341_s18 = sphi %s1401_s18, %s1726_s18  }
   0x8   : > { %p61_p0 = scmp.ne.s32.totalorder %s1345_s19, %s1341_s18  ;;  %p1435_p1 = scmp.eq.s32.totalorder %s933_s24, 0 }
   0x9   : > { %p1439_p2 = scmp.eq.s32.totalorder %s933_s24, 1  ;;  %p199_p3 = scmp.eq.s32.totalorder %s934_s25, 1 }
   0xa   : > { %s1712_s26 = scalar_select %p1435_p1, 1, 0 }
   0xb   : > { %p1445_p4 = por %p1435_p1, %p61_p0  ;;  %p935_p5 = scmp.ge.s32.totalorder %s1361_s23, 1 }
   0xc   : > { %p1450_p6 = por %p199_p3, %p61_p0  ;;  %p206_p7 = scmp.lt.s32.totalorder %s1361_s23, 3 }
   0xd   : > { %s1714_s28 = scalar_select %p1445_p4, 1, 0 }
   0xe   : > { %s1715_s29 = scalar_select %p1450_p6, 1, 0 }
   0xf   : > { %p1455_p8 = pnand %p935_p5, %p206_p7  ;;  %s1363_s6 = smov [#allocation5]  }
  0x10   : > { %s220_s7 = sshll.u32 %s1363_s6, 4  ;;  %s1364_s9 = smov [#allocation7]   ;;  %s1459_s7 = int_to_ptr.vmem [resolvable:$true] %s220_s7 }
  0x11   : > { %p1090_p9 = pneg %p1455_p8  ;;  %s243_s10 = sshll.u32 %s1364_s9, 4  ;;  %s1470_s10 = int_to_ptr.vmem [resolvable:$true] %s243_s10 }
  0x12   : > { %s1189_s13 = scalar_lea.hbm %s1702_s1, 1024 }
  0x13   : > { %p1466_p11 = pnand %p1090_p9, %p1435_p1  ;;  %p1190_p12 = scmp.ne.s32.totalorder %s1702_s1, %s1189_s13 }
  0x14   : > { %p1196_p5 = scmp.lt.u32.totalorder %s1189_s13, %s1702_s1 }
  0x15   : > { %p1191_p13 = pneg %p1466_p11 }
  0x17   : > { %p1192_p0 = pnand %p1191_p13, %p1190_p12 }
  0x19   : > { %p1193_p3 = pneg %p1192_p0 }
  0x1b   : > { %p1198_p7 = pnand %p1196_p5, %p1193_p3 }
  0x1d   : > { %1201 = shalt.err (!%p1198_p7)
}
  0x1e   : > { %s1202_s24 = scalar_lea.vmem %s1459_s7, 1024  ;;  %p1210_p1 = scmp.lt.s32.totalorder %s1459_s7, %s1459_s7 }
  0x1f   : > { %p1203_p9 = scmp.ne.s32.totalorder %s1459_s7, %s1202_s24  ;;  %p1211_p12 = scmp.lt.s32.totalorder %s1202_s24, %s1202_s24 }
  0x21   : > { %p1205_p10 = pnand %p1203_p9, %p1191_p13  ;;  %p1212_p0 = por %p1211_p12, %p1210_p1 }
  0x23   : > { %p1206_p6 = pneg %p1205_p10 }
  0x25   : > { %p1213_p4 = pnand %p1212_p0, %p1206_p6 }
  0x27   : > { %1216 = shalt.err (!%p1213_p4)
}
  0x28   : > { %s1710_s25 = smov 64   ;;  %s1366_s6 = smov 4  }
  0x29   : > { %1093 = dma.hbm_to_vmem [thread:$0]  (!%p1466_p11), %s1702_s1, 1024, %s1459_s7, [#allocation6], %s1710_s25, %s1710_s25, %s1366_s6  }
  0x2a   : > { %s1217_s14 = scalar_lea.hbm %s1704_s3, 1024 }
  0x2b   : > { %p1218_p1 = scmp.ne.s32.totalorder %s1704_s3, %s1217_s14  ;;  %p1224_p10 = scmp.lt.u32.totalorder %s1217_s14, %s1704_s3 }
  0x2d   : > { %p1220_p4 = pnand %p1218_p1, %p1191_p13 }
  0x2f   : > { %p1221_p6 = pneg %p1220_p4 }
  0x31   : > { %p1226_p3 = pnand %p1224_p10, %p1221_p6 }
  0x33   : > { %1229 = shalt.err (!%p1226_p3)
}
  0x34   : > { %s1230_s7 = scalar_lea.vmem %s1470_s10, 1024  ;;  %p1238_p12 = scmp.lt.s32.totalorder %s1470_s10, %s1470_s10 }
  0x35   : > { %p1231_p5 = scmp.ne.s32.totalorder %s1470_s10, %s1230_s7  ;;  %p1239_p0 = scmp.lt.s32.totalorder %s1230_s7, %s1230_s7 }
  0x37   : > { %p1233_p7 = pnand %p1231_p5, %p1191_p13  ;;  %p1240_p1 = por %p1239_p0, %p1238_p12 }
  0x39   : > { %p1234_p9 = pneg %p1233_p7 }
  0x3b   : > { %p1241_p4 = pnand %p1240_p1, %p1234_p9 }
  0x3d   : > { %1244 = shalt.err (!%p1241_p4)
}
  0x3e   : > { %1096 = dma.hbm_to_vmem [thread:$0]  (!%p1466_p11), %s1704_s3, 1024, %s1470_s10, [#allocation6], %s1710_s25, %s1710_s25, %s1366_s6  }
  0x3f   : > { %s41_s8 = sadd.s32 1, %s1357_s22  ;;  %s48_s12 = sadd.s32 1, %s1349_s20 }
  0x40   : > { %p43_p13 = scmp.ge.s32.totalorder %s41_s8, 2  ;;  %p55_p6 = scmp.ne.s32.totalorder %s1349_s20, %s1345_s19 }
  0x41   : > { %p56_p10 = scmp.eq.s32.totalorder %s1361_s23, 0  ;;  %p1107_p3 = scmp.lt.s32.totalorder %s1361_s23, 2 }
  0x42   : > { %s1732_s8 = smov (%p43_p13, %s41_s8), 0  ;;  %p1540_p7 = por %p1439_p2, %p55_p6 }
  0x43   : > { %p57_p5 = por %p56_p10, %p55_p6  ;;  %s45_s14 = ssub.s32 %s1357_s22, %s1732_s8 }
  0x44   : > { %s1718_s13 = scalar_select %p1540_p7, 1, 0 }
  0x45   : > { %s263_s15 = sand.u32 1, %s1349_s20   ;;  %p46_p9 = scmp.eq.s32.totalorder %s45_s14, 0 }
  0x46   : > { %s941_s10 = sshll.u32 %s263_s15, 6  ;;  %s980_s16 = sshll.u32 %s1357_s22, 10 }
  0x47   : > { %s1549_s17 = scalar_select %p46_p9, %s1349_s20, %s48_s12  }
  0x48   : > { %s1554_s9 = scalar_lea.hbm %s1701_s0, %s980_s16  ;;  %s267_s27 = scalar_lea.vmem [#allocation2], %s941_s10 }
  0x49   : > { %s274_s11 = sshll.u32 %s267_s27, 4  ;;  %p1558_p2 = pnand %p1107_p3, %p57_p5  ;;  %s1562_s11 = int_to_ptr.vmem [resolvable:$true] %s274_s11 }
  0x4a   : > { %s1564_s12 = scalar_lea.sflag [#allocation3], %s263_s15  ;;  %s1245_s14 = scalar_lea.hbm %s1554_s9, 1024 }
  0x4b   : > { %p1246_p11 = scmp.ne.s32.totalorder %s1554_s9, %s1245_s14  ;;  %p1247_p12 = pneg %p1558_p2 }
  0x4c   : > { %s1250_s24 = scalar_lea.hbm %s1701_s0, 2048  ;;  %p1251_p4 = scmp.lt.u32.totalorder %s1554_s9, %s1701_s0 }
  0x4d   : > { %p1248_p0 = pnand %p1247_p12, %p1246_p11  ;;  %p1252_p13 = scmp.lt.u32.totalorder %s1250_s24, %s1245_s14 }
  0x4e   : > { %p1254_p10 = scmp.lt.u32.totalorder %s1245_s14, %s1554_s9 }
  0x4f   : > { %p1249_p1 = pneg %p1248_p0  ;;  %p1253_p6 = por %p1252_p13, %p1251_p4 }
  0x51   : > { %p1255_p3 = por %p1254_p10, %p1253_p6 }
  0x53   : > { %p1256_p5 = pnand %p1255_p3, %p1249_p1 }
  0x55   : > { %1259 = shalt.err (!%p1256_p5)
}
  0x56   : > { %s1260_s15 = scalar_lea.vmem %s1562_s11, 1024  ;;  %s1367_s10 = smov [#allocation2]  }
  0x57   : > { %p1261_p9 = scmp.ne.s32.totalorder %s1562_s11, %s1260_s15  ;;  %s1265_s16 = sshll.u32 %s1367_s10, 4  ;;  %s1266_s16 = int_to_ptr.vmem [resolvable:$false] %s1265_s16 }
  0x58   : > { %s1267_s7 = scalar_lea.vmem %s1266_s16, 2048  ;;  %p1268_p7 = scmp.lt.s32.totalorder %s1562_s11, %s1266_s16 }
  0x59   : > { %p1263_p11 = pnand %p1261_p9, %p1247_p12  ;;  %p1269_p4 = scmp.lt.s32.totalorder %s1267_s7, %s1260_s15 }
  0x5b   : > { %p1264_p0 = pneg %p1263_p11  ;;  %p1270_p13 = por %p1269_p4, %p1268_p7 }
  0x5d   : > { %p1271_p6 = pnand %p1270_p13, %p1264_p0 }
  0x5f   : > { %1274 = shalt.err (!%p1271_p6)
}
  0x60   : > { %s1720_s14 = smov 64   ;;  %286 = sbr.rel (%p1455_p8) target bundleno = 618 (0x26a), region = 40 }
  0x61   : > { %1100 = dma.hbm_to_vmem [thread:$0]  (!%p1558_p2), %s1554_s9, 1024, %s1562_s11, %s1564_s12, %s1720_s14, %s1720_s14, %s1366_s6  }
  0x62   : > { %s1598_s24 = sand.u32 (!%p1455_p8), 1, %s1345_s19   ;;  %p1721_p7 = scmp.ne.s32.totalorder (!%p1455_p8), %s1714_s28, 0 }
  0x63   : > { %s945_s27 = sshll.u32 (!%p1455_p8), %s1598_s24, 6  ;;  %s289_s15 = scalar_lea.sflag (!%p1455_p8), [#allocation3], %s1598_s24 }
  0x64   : > { %s1602_s10 = scalar_lea.vmem (!%p1455_p8), [#allocation2], %s945_s27 }
  0x67   : > { %1328 = dma.done.wait (%p1721_p7), %s289_s15, 1024  }
  0x68   : > { %1330 = vsyncadd (%p1721_p7), %s289_s15, 4294966272  ;;  %p1722_p2 = scmp.ne.s32.totalorder %s1712_s26, 0 }
  0x6a   : > { %1332 = dma.done.wait (%p1722_p2), [#allocation6], 2048  }
  0x6b   : > { %1334 = vsyncadd (%p1722_p2), [#allocation6], 4294965248  ;;  %v1165_v0 = vld [vmem:[#allocation5] sm:$0xff]   ;;  %v1166_v1 = vld [vmem:[#allocation5 + $0x8] sm:$0xff]   ;;  %s948_s30 = sshll.u32 %s1598_s24, 7  ;;  %s981_s11 = sshll.u32 %s1353_s21, 11 }
  0x6c   : > { %1014 = vmatprep.subr.bf16.mxu0 %v1165_v0  ;;  %v1167_v2 = vld [vmem:[#allocation5 + $0x10] sm:$0xff]   ;;  %v1168_v3 = vld [vmem:[#allocation5 + $0x18] sm:$0xff]   ;;  %v1173_v4 = vld [vmem:[%s1602_s10] sm:$0xff]   ;;  %s1627_s9 = scalar_lea.vmem [#allocation8], %s948_s30  ;;  %s1647_s14 = scalar_lea.hbm %s1706_s5, %s981_s11 }
  0x6d   : > { %1015 = vmatpush3.bf16.msra.mxu0 %v1165_v0  ;;  %1030 = vmatprep.mubr.bf16.mxu0 %v1173_v4  ;;  %v1169_v5 = vld [vmem:[#allocation5 + $0x20] sm:$0xff]   ;;  %v1170_v6 = vld [vmem:[#allocation5 + $0x28] sm:$0xff]   ;;  %v1171_v9 = vld [vmem:[#allocation5 + $0x30] sm:$0xff]   ;;  %s798_s12 = sshll.u32 %s1627_s9, 4  ;;  %s784_s21 = scalar_lea.sflag [#allocation4], %s1598_s24  ;;  %s1649_s12 = int_to_ptr.vmem [resolvable:$true] %s798_s12 }
  0x6e   : > { %1016 = vmatprep.subr.bf16.mxu0 %v1166_v1  ;;  %v1181_v7 = vld [vmem:[#allocation7] sm:$0xff]   ;;  %v1182_v8 = vld [vmem:[#allocation7 + $0x8] sm:$0xff]   ;;  %v1183_v10 = vld [vmem:[#allocation7 + $0x10] sm:$0xff]   ;;  %s1275_s27 = scalar_lea.vmem %s1649_s12, 2048  ;;  %p1723_p12 = scmp.ne.s32.totalorder %s1718_s13, 0 }
  0x6f   : > { %1046 = vmatprep.subr.bf16.mxu1 %v1181_v7  ;;  %v1172_v11 = vld [vmem:[#allocation5 + $0x38] sm:$0xff]   ;;  %v1185_v13 = vld [vmem:[#allocation7 + $0x20] sm:$0xff]   ;;  %v1174_v14 = vld [vmem:[%s1602_s10 + $0x8] sm:$0xff]   ;;  %p1276_p8 = scmp.ne.s32.totalorder %s1649_s12, %s1275_s27  ;;  %s1368_s15 = smov [#allocation8]  }
  0x70   : > { %1047 = vmatpush3.bf16.msra.mxu1 %v1181_v7  ;;  %v1184_v12 = vld [vmem:[#allocation7 + $0x18] sm:$0xff]   ;;  %v1175_v15 = vld [vmem:[%s1602_s10 + $0x10] sm:$0xff]   ;;  %v1186_v16 = vld [vmem:[#allocation7 + $0x28] sm:$0xff]  }
  0x71   : > { %1017 = vmatpush3.bf16.msra.mxu0 %v1166_v1  ;;  %1048 = vmatprep.subr.bf16.mxu1 %v1182_v8  ;;  %v1176_v17 = vld [vmem:[%s1602_s10 + $0x18] sm:$0xff]   ;;  %v1177_v18 = vld [vmem:[%s1602_s10 + $0x20] sm:$0xff]   ;;  %v1178_v19 = vld [vmem:[%s1602_s10 + $0x28] sm:$0xff]   ;;  %p1277_p1 = pnand %p1276_p8, %p1723_p12 }
  0x72   : > { %1018 = vmatprep.subr.bf16.mxu0 %v1167_v2  ;;  %v1179_v20 = vld [vmem:[%s1602_s10 + $0x30] sm:$0xff]   ;;  %v1180_v21 = vld [vmem:[%s1602_s10 + $0x38] sm:$0xff]   ;;  %v949_v24 = vld [vmem:[%s1703_s2] ss:$0 sm:$0xff]  ;;  %s1279_s10 = sshll.u32 %s1368_s15, 4  ;;  %s1280_s10 = int_to_ptr.vmem [resolvable:$false] %s1279_s10 }
  0x73   : > { %v1187_v22 = vld [vmem:[#allocation7 + $0x30] sm:$0xff]   ;;  %v1188_v23 = vld [vmem:[#allocation7 + $0x38] sm:$0xff]   ;;  %p1278_p10 = pneg %p1277_p1  ;;  %s1281_s26 = scalar_lea.vmem %s1280_s10, 4096 }
  0x74   : > { %1049 = vmatpush3.bf16.msra.mxu1 %v1182_v8  ;;  %p1282_p3 = scmp.lt.s32.totalorder %s1649_s12, %s1280_s10  ;;  %p1283_p5 = scmp.lt.s32.totalorder %s1281_s26, %s1275_s27 }
  0x75   : > { %1019 = vmatpush3.bf16.msra.mxu0 %v1167_v2  ;;  %1050 = vmatprep.subr.bf16.mxu1 %v1183_v10 }
  0x76   : > { %1020 = vmatprep.subr.bf16.mxu0 %v1168_v3  ;;  %p1284_p9 = por %p1283_p5, %p1282_p3 }
  0x78   : > { %1051 = vmatpush3.bf16.msra.mxu1 %v1183_v10  ;;  %p1285_p11 = pnand %p1284_p9, %p1278_p10 }
  0x79   : > { %1021 = vmatpush3.bf16.msra.mxu0 %v1168_v3  ;;  %1052 = vmatprep.subr.bf16.mxu1 %v1184_v12 }
  0x7a   : > { %1022 = vmatprep.subr.bf16.mxu0 %v1169_v5 }
  0x7c   : > { %1053 = vmatpush3.bf16.msra.mxu1 %v1184_v12 }
  0x7d   : > { %1023 = vmatpush3.bf16.msra.mxu0 %v1169_v5  ;;  %1054 = vmatprep.subr.bf16.mxu1 %v1185_v13 }
  0x7e   : > { %1024 = vmatprep.subr.bf16.mxu0 %v1170_v6 }
  0x80   : > { %1055 = vmatpush3.bf16.msra.mxu1 %v1185_v13 }
  0x81   : > { %1025 = vmatpush3.bf16.msra.mxu0 %v1170_v6  ;;  %1056 = vmatprep.subr.bf16.mxu1 %v1186_v16 }
  0x82   : > { %1026 = vmatprep.subr.bf16.mxu0 %v1171_v9 }
  0x84   : > { %1057 = vmatpush3.bf16.msra.mxu1 %v1186_v16 }
  0x85   : > { %1027 = vmatpush3.bf16.msra.mxu0 %v1171_v9  ;;  %1058 = vmatprep.subr.bf16.mxu1 %v1187_v22 }
  0x86   : > { %1028 = vmatprep.subr.bf16.mxu0 %v1172_v11 }
  0x88   : > { %1059 = vmatpush3.bf16.msra.mxu1 %v1187_v22 }
  0x89   : > { %1029 = vmatpush3.bf16.msra.mxu0 %v1172_v11  ;;  %1060 = vmatprep.subr.bf16.mxu1 %v1188_v23 }
  0x8c   : > { %1031 = vmatmul.mubr.bf16.vlgmr.msra.gmra.mrb[0].mxu0 %v1174_v14  ;;  %1061 = vmatpush3.bf16.msra.mxu1 %v1188_v23 }
  0x8d   : > { %1034 = vmatprep.mubr.bf16.mxu0 %v1175_v15 }
  0x94   : > { %1035 = vmatmul.mubr.bf16.gmra.mrb[4].mxu0 %v1176_v17  ;;  %v966_v17 = vld [vmem:[%s1705_s4] ss:$0 sm:$0xff] }
  0x95   : > { %1038 = vmatprep.mubr.bf16.mxu0 %v1177_v18 }
  0x9c   : > { %1039 = vmatmul.mubr.bf16.gmra.mrb[8].mxu0 %v1178_v19 }
  0x9d   : > { %1042 = vmatprep.mubr.bf16.mxu0 %v1179_v20 }
  0xa4   : > { %1043 = vmatmul.mubr.bf16.gmra.mrb[12].mxu0 %v1180_v21 }
 0x15f   : > { %v1032_v25 = vpop.f32.mrb[0].mxu0 }
 0x160   : > { %v521_v26 = vadd.f32 %v1032_v25, %v949_v24  ;;  %v512_v27 = vpop.f32.mrb[1].mxu0 }
 0x161   : > { %v513_v28 = vadd.f32 %v949_v24, %v512_v27  ;;  %v1033_v29 = vpop.f32.mrb[2].mxu0 }
 0x162   : > { %v524_v30 = vadd.f32 %v1033_v29, %v949_v24  ;;  %v515_v31 = vpop.f32.mrb[3].mxu0  ;;  %v577_v33 = vmax.f32 %v521_v26, 0.0 }
 0x163   : > { %v516_v32 = vadd.f32 %v949_v24, %v515_v31  ;;  %v575_v35 = vmax.f32 %v513_v28, 0.0 }
 0x164   : > { %v578_v34 = vmax.f32 %v524_v30, 0.0 }
 0x165   : > { %v576_v36 = vmax.f32 %v516_v32, 0.0 }
 0x166   : > { %v592_v37 = vpack.c.bf16 %v578_v34, %v577_v33 }
 0x167   : > { %v1036_v38 = vpop.f32.mrb[4].mxu0  ;;  %v591_v39 = vpack.c.bf16 %v576_v36, %v575_v35 }
 0x168   : > { %v537_v40 = vadd.f32 %v1036_v38, %v949_v24  ;;  %v528_v41 = vpop.f32.mrb[5].mxu0 }
 0x169   : > { %v529_v42 = vadd.f32 %v949_v24, %v528_v41  ;;  %v1037_v43 = vpop.f32.mrb[6].mxu0  ;;  %1062 = vmatprep.mubr.bf16.mxu1 %v591_v39 }
 0x16a   : > { %v540_v44 = vadd.f32 %v1037_v43, %v949_v24  ;;  %v531_v45 = vpop.f32.mrb[7].mxu0  ;;  %1063 = vmatmul.mubr.bf16.vlgmr.msra.gmra.mrb[0].mxu1 %v592_v37  ;;  %v581_v47 = vmax.f32 %v537_v40, 0.0 }
 0x16b   : > { %v532_v46 = vadd.f32 %v949_v24, %v531_v45  ;;  %v579_v49 = vmax.f32 %v529_v42, 0.0 }
 0x16c   : > { %v582_v48 = vmax.f32 %v540_v44, 0.0 }
 0x16d   : > { %v580_v50 = vmax.f32 %v532_v46, 0.0 }
 0x16e   : > { %v594_v51 = vpack.c.bf16 %v582_v48, %v581_v47 }
 0x16f   : > { %v593_v52 = vpack.c.bf16 %v580_v50, %v579_v49  ;;  %v1040_v53 = vpop.f32.mrb[8].mxu0 }
 0x170   : > { %v553_v54 = vadd.f32 %v1040_v53, %v949_v24  ;;  %v544_v55 = vpop.f32.mrb[9].mxu0 }
 0x171   : > { %v545_v56 = vadd.f32 %v949_v24, %v544_v55  ;;  %v1041_v57 = vpop.f32.mrb[10].mxu0  ;;  %1066 = vmatprep.mubr.bf16.mxu1 %v593_v52 }
 0x172   : > { %v556_v58 = vadd.f32 %v1041_v57, %v949_v24  ;;  %v547_v59 = vpop.f32.mrb[11].mxu0  ;;  %1067 = vmatmul.mubr.bf16.gmra.mrb[4].mxu1 %v594_v51  ;;  %v585_v61 = vmax.f32 %v553_v54, 0.0 }
 0x173   : > { %v548_v60 = vadd.f32 %v949_v24, %v547_v59  ;;  %v583_v63 = vmax.f32 %v545_v56, 0.0 }
 0x174   : > { %v586_v62 = vmax.f32 %v556_v58, 0.0 }
 0x175   : > { %v584_v0 = vmax.f32 %v548_v60, 0.0 }
 0x176   : > { %v596_v1 = vpack.c.bf16 %v586_v62, %v585_v61 }
 0x177   : > { %v595_v2 = vpack.c.bf16 %v584_v0, %v583_v63  ;;  %v1044_v3 = vpop.f32.mrb[12].mxu0 }
 0x178   : > { %v569_v4 = vadd.f32 %v1044_v3, %v949_v24  ;;  %v560_v5 = vpop.f32.mrb[13].mxu0 }
 0x179   : > { %v561_v6 = vadd.f32 %v949_v24, %v560_v5  ;;  %v1045_v7 = vpop.f32.mrb[14].mxu0  ;;  %1070 = vmatprep.mubr.bf16.mxu1 %v595_v2 }
 0x17a   : > { %v572_v8 = vadd.f32 %v1045_v7, %v949_v24  ;;  %v563_v9 = vpop.f32.mrb[15].mxu0  ;;  %1071 = vmatmul.mubr.bf16.gmra.mrb[8].mxu1 %v596_v1  ;;  %v589_v11 = vmax.f32 %v569_v4, 0.0 }
 0x17b   : > { %v564_v10 = vadd.f32 %v949_v24, %v563_v9  ;;  %v587_v13 = vmax.f32 %v561_v6, 0.0 }
 0x17c   : > { %v590_v12 = vmax.f32 %v572_v8, 0.0 }
 0x17d   : > { %v588_v14 = vmax.f32 %v564_v10, 0.0 }
 0x17e   : > { %v598_v15 = vpack.c.bf16 %v590_v12, %v589_v11 }
 0x17f   : > { %v597_v16 = vpack.c.bf16 %v588_v14, %v587_v13 }
 0x181   : > { %1074 = vmatprep.mubr.bf16.mxu1 %v597_v16 }
 0x182   : > { %1075 = vmatmul.mubr.bf16.gmra.mrb[12].mxu1 %v598_v15 }
 0x23d   : > { %v1064_v18 = vpop.f32.mrb[0].mxu1 }
 0x23e   : > { %v713_v19 = vadd.f32 %v1064_v18, %v966_v17  ;;  %v704_v20 = vpop.f32.mrb[1].mxu1 }
 0x23f   : > { %v705_v21 = vadd.f32 %v966_v17, %v704_v20  ;;  %v1065_v22 = vpop.f32.mrb[2].mxu1 }
 0x240   : > { %769 = vst [vmem:[%s1627_s9 + $0x10] sm:$0xff] %v713_v19  ;;  %v716_v23 = vadd.f32 %v1065_v22, %v966_v17  ;;  %v707_v24 = vpop.f32.mrb[3].mxu1 }
 0x241   : > { %767 = vst [vmem:[%s1627_s9] sm:$0xff] %v705_v21  ;;  %v708_v25 = vadd.f32 %v966_v17, %v707_v24 }
 0x242   : > { %770 = vst [vmem:[%s1627_s9 + $0x18] sm:$0xff] %v716_v23 }
 0x243   : > { %768 = vst [vmem:[%s1627_s9 + $0x8] sm:$0xff] %v708_v25 }
 0x245   : > { %v1068_v26 = vpop.f32.mrb[4].mxu1 }
 0x246   : > { %v729_v27 = vadd.f32 %v1068_v26, %v966_v17  ;;  %v720_v28 = vpop.f32.mrb[5].mxu1 }
 0x247   : > { %v721_v29 = vadd.f32 %v966_v17, %v720_v28  ;;  %v1069_v30 = vpop.f32.mrb[6].mxu1 }
 0x248   : > { %773 = vst [vmem:[%s1627_s9 + $0x30] sm:$0xff] %v729_v27  ;;  %v732_v31 = vadd.f32 %v1069_v30, %v966_v17  ;;  %v723_v32 = vpop.f32.mrb[7].mxu1 }
 0x249   : > { %771 = vst [vmem:[%s1627_s9 + $0x20] sm:$0xff] %v721_v29  ;;  %v724_v33 = vadd.f32 %v966_v17, %v723_v32 }
 0x24a   : > { %774 = vst [vmem:[%s1627_s9 + $0x38] sm:$0xff] %v732_v31 }
 0x24b   : > { %772 = vst [vmem:[%s1627_s9 + $0x28] sm:$0xff] %v724_v33 }
 0x24d   : > { %v1072_v34 = vpop.f32.mrb[8].mxu1 }
 0x24e   : > { %v745_v35 = vadd.f32 %v1072_v34, %v966_v17  ;;  %v736_v36 = vpop.f32.mrb[9].mxu1 }
 0x24f   : > { %v737_v37 = vadd.f32 %v966_v17, %v736_v36  ;;  %v1073_v38 = vpop.f32.mrb[10].mxu1 }
 0x250   : > { %777 = vst [vmem:[%s1627_s9 + $0x50] sm:$0xff] %v745_v35  ;;  %v748_v39 = vadd.f32 %v1073_v38, %v966_v17  ;;  %v739_v40 = vpop.f32.mrb[11].mxu1 }
 0x251   : > { %775 = vst [vmem:[%s1627_s9 + $0x40] sm:$0xff] %v737_v37  ;;  %v740_v41 = vadd.f32 %v966_v17, %v739_v40 }
 0x252   : > { %778 = vst [vmem:[%s1627_s9 + $0x58] sm:$0xff] %v748_v39 }
 0x253   : > { %776 = vst [vmem:[%s1627_s9 + $0x48] sm:$0xff] %v740_v41 }
 0x255   : > { %v1076_v42 = vpop.f32.mrb[12].mxu1 }
 0x256   : > { %v761_v43 = vadd.f32 %v1076_v42, %v966_v17  ;;  %v752_v44 = vpop.f32.mrb[13].mxu1 }
 0x257   : > { %v753_v45 = vadd.f32 %v966_v17, %v752_v44  ;;  %v1077_v46 = vpop.f32.mrb[14].mxu1 }
 0x258   : > { %781 = vst [vmem:[%s1627_s9 + $0x70] sm:$0xff] %v761_v43  ;;  %v764_v47 = vadd.f32 %v1077_v46, %v966_v17  ;;  %v755_v48 = vpop.f32.mrb[15].mxu1 }
 0x259   : > { %779 = vst [vmem:[%s1627_s9 + $0x60] sm:$0xff] %v753_v45  ;;  %v756_v49 = vadd.f32 %v966_v17, %v755_v48 }
 0x25a   : > { %782 = vst [vmem:[%s1627_s9 + $0x78] sm:$0xff] %v764_v47 }
 0x25b   : > { %780 = vst [vmem:[%s1627_s9 + $0x68] sm:$0xff] %v756_v49 }
 0x25c   : > { %1288 = shalt.err (!%p1285_p11)
}
 0x25d   : > { %s1289_s28 = scalar_lea.hbm %s1647_s14, 2048  ;;  %s1293_s6 = scalar_lea.hbm %s1706_s5, 4096 }
 0x25e   : > { %p1290_p0 = scmp.ne.s32.totalorder %s1647_s14, %s1289_s28  ;;  %p1294_p6 = scmp.lt.u32.totalorder %s1647_s14, %s1706_s5 }
 0x25f   : > { %p1295_p7 = scmp.lt.u32.totalorder %s1293_s6, %s1289_s28  ;;  %p1297_p8 = scmp.lt.u32.totalorder %s1289_s28, %s1647_s14 }
 0x260   : > { %p1291_p4 = pnand %p1290_p0, %p1723_p12 }
 0x261   : > { %p1296_p2 = por %p1295_p7, %p1294_p6 }
 0x262   : > { %p1292_p13 = pneg %p1291_p4 }
 0x263   : > { %p1298_p1 = por %p1297_p8, %p1296_p2 }
 0x265   : > { %p1299_p10 = pnand %p1298_p1, %p1292_p13 }
 0x267   : > { %1302 = shalt.err (!%p1299_p10)
}
 0x268   : > { %s1369_s16 = smov 128   ;;  %s1370_s7 = smov 8  }
 0x269   : > { %1088 = dma.vmem_to_hbm [thread:$0]  (%p1723_p12), %s1649_s12, 2048, %s1647_s14, %s784_s21, %s1369_s16, %s1369_s16, %s1370_s7  }
 0x26a PF: > { %s813_s27 = sand.u32 1, %s1341_s18   ;;  %p1724_p3 = scmp.ne.s32.totalorder %s1715_s29, 0 }
 0x26b   : > { %p1725_p5 = scmp.ge.s32.totalorder %s1361_s23, 2  ;;  %s814_s15 = scalar_lea.sflag [#allocation4], %s813_s27 }
 0x26d   : > { %p1102_p9 = pnand %p1725_p5, %p1724_p3 }
 0x26f   : > { %1336 = dma.done.wait (!%p1102_p9), %s814_s15, 2048  }
 0x270   : > { %1338 = vsyncadd (!%p1102_p9), %s814_s15, 4294965248  ;;  %s22_s23 = sadd.s32 1, %s1361_s23   ;;  %s1726_s18 = smov %s1345_s19 }
 0x271   : > { %p19_p11 = scmp.ge.s32.totalorder %s22_s23, 4   ;;  %s1727_s19 = smov %s1349_s20 }
 0x272   : > { %s1728_s20 = smov %s1549_s17  ;;  %s1729_s21 = smov %s1357_s22 }
 0x273   : > { %s1730_s22 = smov %s1732_s8  ;;  %21 = sbr.rel (!%p19_p11) target bundleno = 7 (0x7), region = 101 }
 0x27a   :  { %819 = vsyncpa [#allocation3], 1 }
 0x27b   :  { %821 = vsyncpa [#allocation3 + $0x1], 1 }
 0x27c   :  { %822 = vsyncpa [#allocation6], 1 }
 0x27d   :  { %823 = vsyncpa [#allocation4], 1 }
 0x27e   :  { %825 = vsyncpa [#allocation4 + $0x1], 1 }

</bundles_post_ra>
